<compile_context>
chip_gen: v5e
topology: v5e:2x2
jax: 0.10.0
libtpu: 0.0.40
codegen_flags: <defaults>
</compile_context>

<pallas_src>
import functools
import math

import jax
import jax.numpy as jnp
from jax.experimental import pallas as pl
from jax.experimental.pallas import tpu as pltpu

SUBLANE = 8          # vreg sublane count (second-to-last dim granularity)
GRID_TILE = 256      # batch tile used only for large batches (megacore path)


def _round_up(n, m):
    return ((n + m - 1) // m) * m


# ------------------------------ Pallas kernel --------------------------------
def _fused_mlp_kernel(x_ref, w_ref, b_ref, o_ref, *, meta, n_outputs):
    """Whole MLP fused in one kernel body.

    x_ref : [Bt, n_inputs]              f32  (unpadded, full-extent block)
    w_ref : [sum(round8(d_in)), d_max]  bf16 (all layer weights, one slab)
    b_ref : [n_layers, d_max]           f32  (all biases, one slab)
    o_ref : [Bt, n_outputs]             f32  (unpadded, full-extent block)

    meta: static tuple of (row_offset, d_in) per layer. Intermediates stay in
    vregs (never touch HBM). MXU operands are bf16; accumulation, bias add and
    ReLU are f32. Zero-padded weight/bias columns keep padded lanes exactly 0.
    """
    n_layers = len(meta)
    h = x_ref[...].astype(jnp.float32)                      # [Bt, n_inputs]
    for i, (off, d_in) in enumerate(meta):
        hin = h if h.shape[1] == d_in else h[:, :d_in]      # static slice; dropped cols are 0
        w = w_ref[pl.ds(off, d_in), :]                      # [d_in, d_max] bf16 (static view)
        acc = jnp.dot(hin.astype(jnp.bfloat16), w,
                      preferred_element_type=jnp.float32)   # f32 accumulate on MXU
        acc = acc + b_ref[pl.ds(i, 1), :]                   # f32 bias, broadcast over rows
        h = acc if i == n_layers - 1 else jnp.maximum(acc, 0.0)
    o_ref[...] = h[:, :n_outputs].astype(o_ref.dtype)


# --------------------------- parameter handling -------------------------------
def init_mlp_params(key, layer_sizes):
    """PyTorch-style uniform(-1/sqrt(fan_in), 1/sqrt(fan_in)) init, W as [Din, Dout]."""
    params = []
    for d_in, d_out in zip(layer_sizes[:-1], layer_sizes[1:]):
        kw, kb, key = jax.random.split(key, 3)
        bound = 1.0 / math.sqrt(float(d_in))
        w = jax.random.uniform(kw, (d_in, d_out), jnp.float32, -bound, bound)
        b = jax.random.uniform(kb, (d_out,), jnp.float32, -bound, bound)
        params.append((w, b))
    return params


def pack_params(params):
    """Pack every (W, b) once at init time into two slabs.

    W: rows (Din) padded only to a multiple of 8 (sublane), columns (Dout) padded only
       to the max layer width, stored in bf16 -> minimal HBM bytes, MXU-native dtype.
    b: kept f32 (elementwise math stays f32; matters on v5e).
    Zero padding keeps all valid outputs exact through the whole chain.
    Returns (w_slab, b_slab, meta) where meta[i] = (row_offset, d_in) for layer i.
    """
    d_max = max(w.shape[1] for w, _ in params)
    w_blocks, b_rows, meta = [], [], []
    off = 0
    for w, b in params:
        d_in, d_out = w.shape
        d_in_p = _round_up(d_in, SUBLANE)
        w_blocks.append(
            jnp.zeros((d_in_p, d_max), jnp.float32).at[:d_in, :d_out].set(w))
        b_rows.append(jnp.zeros((1, d_max), jnp.float32).at[0, :d_out].set(b))
        meta.append((off, d_in))
        off += d_in_p
    w_slab = jnp.concatenate(w_blocks, axis=0).astype(jnp.bfloat16)
    b_slab = jnp.concatenate(b_rows, axis=0)
    return w_slab, b_slab, tuple(meta)


# --------------------------- fused Net forward -------------------------------
def make_net_forward(w_slab, b_slab, meta, batch, n_inputs, n_outputs):
    """Build a forward fn equivalent to Net.forward(x, t) (t is unused by the module)."""
    kernel = functools.partial(_fused_mlp_kernel, meta=meta, n_outputs=n_outputs)

    # Advisory cost estimate from the true work / bytes the kernel actually does.
    d_max = int(w_slab.shape[1])
    flops = 2 * batch * d_max * sum(d_in for _, d_in in meta)
    bytes_accessed = (4 * batch * (n_inputs + n_outputs)
                      + 2 * int(w_slab.size) + 4 * int(b_slab.size))
    cost = pl.CostEstimate(flops=flops, transcendentals=0,
                           bytes_accessed=bytes_accessed)

    use_grid = batch >= 2 * GRID_TILE and batch % GRID_TILE == 0
    if use_grid:
        # Large (replay-memory sized) batches: parallel batch grid so v7x's two
        # TensorCores split the rows; params stay resident (block index fixed).
        call = pl.pallas_call(
            kernel,
            out_shape=jax.ShapeDtypeStruct((batch, n_outputs), jnp.float32),
            grid=(batch // GRID_TILE,),
            in_specs=[
                pl.BlockSpec((GRID_TILE, n_inputs), lambda i: (i, 0)),
                pl.BlockSpec(tuple(w_slab.shape), lambda i: (0, 0)),
                pl.BlockSpec(tuple(b_slab.shape), lambda i: (0, 0)),
            ],
            out_specs=pl.BlockSpec((GRID_TILE, n_outputs), lambda i: (i, 0)),
            cost_estimate=cost,
            compiler_params=pltpu.CompilerParams(
                dimension_semantics=("parallel",)),
        )
    else:
        # Tiny batch: single grid-less invocation, everything full-extent in VMEM.
        call = pl.pallas_call(
            kernel,
            out_shape=jax.ShapeDtypeStruct((batch, n_outputs), jnp.float32),
            in_specs=[
                pl.BlockSpec((batch, n_inputs), lambda: (0, 0)),
                pl.BlockSpec(tuple(w_slab.shape), lambda: (0, 0)),
                pl.BlockSpec(tuple(b_slab.shape), lambda: (0, 0)),
            ],
            out_specs=pl.BlockSpec((batch, n_outputs), lambda: (0, 0)),
            cost_estimate=cost,
        )

    @jax.jit
    def _jitted(x):
        # x enters unpadded and the kernel emits the unpadded output directly:
        # no host-side pad / slice HLOs around the pallas_call.
        return call(x, w_slab, b_slab)

    def forward(x, t=0):
        del t  # Net.forward(x, t) ignores t (it just returns self.net(x))
        return _jitted(x)

    return forward


# ------------------------------ reference ------------------------------------
def reference_forward(params, x):
    """Matches the kernel numerics: bf16 MXU operands, f32 accumulate/bias/ReLU."""
    h = x
    for i, (w, b) in enumerate(params):
        hq = h.astype(jnp.bfloat16).astype(jnp.float32)
        wq = w.astype(jnp.bfloat16).astype(jnp.float32)
        h = hq @ wq + b
        if i != len(params) - 1:
            h = jnp.maximum(h, 0.0)
    return h


# --------------------------------- main --------------------------------------
if __name__ == "__main__":
    # Config consistent with the module:
    #   n_inputs=32, args.n_hiddens=32, args.n_layers=2, n_outputs=10
    n_inputs, n_hiddens, n_layers, n_outputs = 32, 32, 2, 10
    batch = 2
    layer_sizes = [n_inputs] + [n_hiddens] * n_layers + [n_outputs]

    key = jax.random.PRNGKey(0)
    kx, kp, kx2 = jax.random.split(key, 3)

    params = init_mlp_params(kp, layer_sizes)      # unpadded, for the reference
    w_slab, b_slab, meta = pack_params(params)     # packed once, for the kernel

    # Small-batch (grid-less) path — mirrors the per-sample forwards in observe().
    x = jax.random.normal(kx, (batch, n_inputs), jnp.float32)
    net_forward = make_net_forward(w_slab, b_slab, meta, batch, n_inputs, n_outputs)
    out = jax.block_until_ready(net_forward(x, t=0))
    ref = reference_forward(params, x)
    assert out.shape == (batch, n_outputs)
    assert jnp.allclose(out, ref, atol=1e-3, rtol=1e-3), "mismatch vs reference (small batch)"

    # Larger batch exercises the parallel batch-grid path (v7x megacore).
    big_batch = 512
    xb = jax.random.normal(kx2, (big_batch, n_inputs), jnp.float32)
    net_forward_big = make_net_forward(w_slab, b_slab, meta, big_batch, n_inputs, n_outputs)
    out_b = jax.block_until_ready(net_forward_big(xb, t=0))
    ref_b = reference_forward(params, xb)
    assert out_b.shape == (big_batch, n_outputs)
    assert jnp.allclose(out_b, ref_b, atol=1e-3, rtol=1e-3), "mismatch vs reference (big batch)"

    # TODO(synk): training-side machinery (observe/getBatch, SGD step, CrossEntropyLoss,
    # replay memory M, weight-interpolation with gamma) is host-side control flow, not
    # part of forward — not kernelized.
    print("KERNEL_OK")
</pallas_src>

<mosaic_0001>
module attributes {stable_mosaic.version = 11 : i64} {
  func.func @_fused_mlp_kernel(%arg0: memref<2x32xf32, #tpu.memory_space<vmem>>, %arg1: memref<96x32xbf16, #tpu.memory_space<vmem>>, %arg2: memref<3x32xf32, #tpu.memory_space<vmem>>, %arg3: memref<2x10xf32, #tpu.memory_space<vmem>>) attributes {dimension_semantics = [], scalar_prefetch = 0 : i64, scratch_operands = 0 : i64, tpu.core_type = #tpu.core_type<tc>} {
    %c0 = arith.constant 0 : index
    %c0_0 = arith.constant 0 : index
    %0 = vector.load %arg0[%c0, %c0_0] : memref<2x32xf32, #tpu.memory_space<vmem>>, vector<2x32xf32>
    %c0_1 = arith.constant 0 : index
    %c0_2 = arith.constant 0 : index
    %1 = vector.load %arg1[%c0_1, %c0_2] : memref<96x32xbf16, #tpu.memory_space<vmem>>, vector<32x32xbf16>
    %2 = arith.truncf %0 : vector<2x32xf32> to vector<2x32xbf16>
    %cst = arith.constant dense<0.000000e+00> : vector<2x32xf32>
    %3 = tpu.matmul %2, %1, %cst {dimension_numbers = #tpu.dot_dimension_numbers<[1], [0], [0], [1], [0, 0, 1, 1], [], []>} : vector<2x32xbf16>, vector<32x32xbf16>, vector<2x32xf32> -> vector<2x32xf32>
    %c0_3 = arith.constant 0 : index
    %c0_4 = arith.constant 0 : index
    %4 = vector.load %arg2[%c0_3, %c0_4] : memref<3x32xf32, #tpu.memory_space<vmem>>, vector<1x32xf32>
    %5 = vector.broadcast %4 : vector<1x32xf32> to vector<2x32xf32>
    %6 = arith.addf %3, %5 : vector<2x32xf32>
    %cst_5 = arith.constant 0.000000e+00 : f32
    %7 = vector.broadcast %cst_5 : f32 to vector<2x32xf32>
    %8 = arith.maximumf %6, %7 : vector<2x32xf32>
    %c32 = arith.constant 32 : index
    %c0_6 = arith.constant 0 : index
    %9 = vector.load %arg1[%c32, %c0_6] : memref<96x32xbf16, #tpu.memory_space<vmem>>, vector<32x32xbf16>
    %10 = arith.truncf %8 : vector<2x32xf32> to vector<2x32xbf16>
    %cst_7 = arith.constant dense<0.000000e+00> : vector<2x32xf32>
    %11 = tpu.matmul %10, %9, %cst_7 {dimension_numbers = #tpu.dot_dimension_numbers<[1], [0], [0], [1], [0, 0, 1, 1], [], []>} : vector<2x32xbf16>, vector<32x32xbf16>, vector<2x32xf32> -> vector<2x32xf32>
    %c1 = arith.constant 1 : index
    %c0_8 = arith.constant 0 : index
    %12 = vector.load %arg2[%c1, %c0_8] : memref<3x32xf32, #tpu.memory_space<vmem>>, vector<1x32xf32>
    %13 = vector.broadcast %12 : vector<1x32xf32> to vector<2x32xf32>
    %14 = arith.addf %11, %13 : vector<2x32xf32>
    %cst_9 = arith.constant 0.000000e+00 : f32
    %15 = vector.broadcast %cst_9 : f32 to vector<2x32xf32>
    %16 = arith.maximumf %14, %15 : vector<2x32xf32>
    %c64 = arith.constant 64 : index
    %c0_10 = arith.constant 0 : index
    %17 = vector.load %arg1[%c64, %c0_10] : memref<96x32xbf16, #tpu.memory_space<vmem>>, vector<32x32xbf16>
    %18 = arith.truncf %16 : vector<2x32xf32> to vector<2x32xbf16>
    %cst_11 = arith.constant dense<0.000000e+00> : vector<2x32xf32>
    %19 = tpu.matmul %18, %17, %cst_11 {dimension_numbers = #tpu.dot_dimension_numbers<[1], [0], [0], [1], [0, 0, 1, 1], [], []>} : vector<2x32xbf16>, vector<32x32xbf16>, vector<2x32xf32> -> vector<2x32xf32>
    %c2 = arith.constant 2 : index
    %c0_12 = arith.constant 0 : index
    %20 = vector.load %arg2[%c2, %c0_12] : memref<3x32xf32, #tpu.memory_space<vmem>>, vector<1x32xf32>
    %21 = vector.broadcast %20 : vector<1x32xf32> to vector<2x32xf32>
    %22 = arith.addf %19, %21 : vector<2x32xf32>
    %23 = vector.extract_strided_slice %22 {offsets = [0, 0], sizes = [2, 10], strides = [1, 1]} : vector<2x32xf32> to vector<2x10xf32>
    %c0_13 = arith.constant 0 : index
    %c0_14 = arith.constant 0 : index
    %24 = vector.load %arg3[%c0_13, %c0_14] : memref<2x10xf32, #tpu.memory_space<vmem>>, vector<2x10xf32>
    tpu.vector_store %arg3[%c0_13, %c0_14], %23 {strides = array<i32>} : memref<2x10xf32, #tpu.memory_space<vmem>>, vector<2x10xf32>,
    return
  }
}

</mosaic_0001>

<bundles_post_ra>
// kernel: _jitted.1
= control target key start
LH: loop header
LB: loop body
LE: loop exit
PB: predicated region body
PF: predicated region fallthrough
CT: control target
= control target key end

     0   :  { %8 = vsyncpa [#allocation3], 0  ;;  %s373_s0 = inlined_call_operand.hbm [shape: f32[2,32], index: 0, kind: input, shape index: {}]   ;;  %s374_s1 = inlined_call_operand.hbm [shape: bf16[96,32], index: 1, kind: input, shape index: {}]   ;;  %s375_s2 = inlined_call_operand.hbm [shape: f32[3,32], index: 2, kind: input, shape index: {}]   ;;  %s376_s3 = inlined_call_operand.hbm [shape: f32[2,10], index: 3, kind: output, shape index: {}]  }
   0x1   :  { %9 = vsyncpa [#allocation6], 0  ;;  %s26_s14 = sshll.u32 %s374_s1, 4  ;;  %s27_s14 = int_to_ptr.hbm [resolvable:$true] %s26_s14 }
   0x2   :  { %10 = vsyncpa [#allocation4], 0  ;;  %s332_s15 = smov [#allocation5]   ;;  %s16_s19 = sshll.u32 %s373_s0, 4  ;;  %s17_s19 = int_to_ptr.hbm [resolvable:$true] %s16_s19 }
   0x3   :  { %s28_s16 = sshll.u32 %s332_s15, 4  ;;  %s333_s20 = smov 64   ;;  %s29_s16 = int_to_ptr.vmem [resolvable:$true] %s28_s16 }
   0x4   :  { %s334_s21 = smov 4   ;;  %s335_s22 = smov [#allocation2]  }
   0x5   :  { %34 = dma.hbm_to_vmem [thread:$0]  %s27_s14, 768, %s29_s16, [#allocation6], %s333_s20, %s333_s20, %s334_s21  }
   0x6   :  { %s18_s23 = sshll.u32 %s335_s22, 4  ;;  %s40_s26 = sshll.u32 %s375_s2, 4  ;;  %s19_s23 = int_to_ptr.vmem [resolvable:$true] %s18_s23  ;;  %s41_s26 = int_to_ptr.hbm [resolvable:$true] %s40_s26 }
   0x7   :  { %21 = dma.hbm_to_vmem [thread:$0]  %s17_s19, 32, %s19_s23, [#allocation3]  }
   0x8   :  { %s336_s1 = smov [#allocation7]  }
   0x9   :  { %s42_s27 = sshll.u32 %s336_s1, 4  ;;  %s43_s27 = int_to_ptr.vmem [resolvable:$true] %s42_s27 }
   0xa   :  { %45 = dma.hbm_to_vmem [thread:$0]  %s41_s26, 64, %s43_s27, [#allocation6]  }
   0xb   :  { %326 = dma.done.wait [#allocation3], 32  }
   0xc   :  { %327 = vsyncadd [#allocation3], 4294967264 }
   0xd   :  { %328 = dma.done.wait [#allocation6], 832  }
   0xe   :  { %329 = vsyncadd [#allocation6], 4294966464  ;;  %v216_v0 = vld [vmem:[#allocation5 + $0x8] sm:$0xff]  ;;  %v215_v1 = vld [vmem:[#allocation5] sm:$0xff]  ;;  %vm79_vm0 = vcmask 261120   ;;  %s337_s0 = smov [#allocation8]  }
   0xf   :  { %89 = vmatpush.bf16.msra.mxu0 %v216_v0  ;;  %v59_v2 = vld [vmem:[#allocation2] sm:$0x3]  ;;  %v217_v5 = vld [vmem:[#allocation5 + $0x10] sm:$0xff]  ;;  %v220_v12 = vld [vmem:[#allocation5 + $0x28] sm:$0xff]  ;;  %s175_s2 = sshll.u32 %s337_s0, 4  ;;  %s177_s30 = sshll.u32 %s376_s3, 4  ;;  %s176_s2 = int_to_ptr.vmem [resolvable:$true] %s175_s2  ;;  %s178_s30 = int_to_ptr.hbm [resolvable:$true] %s177_s30 }
  0x10   :  { %v64_v3 = vpack.c.bf16 %v59_v2, %v59_v2  ;;  %v218_v4 = vld [vmem:[#allocation5 + $0x18] sm:$0xff]  ;;  %v227_v6 = vld [vmem:[#allocation7] ss:$0 sm:$0xff]  ;;  %161 = vmatpush.bf16.msra.mxu2 %v220_v12  ;;  %v219_v13 = vld [vmem:[#allocation5 + $0x20] sm:$0xff]  ;;  %vm168_vm1 = vcmask 74752  }
  0x11   :  { %125 = vmatpush.bf16.msra.mxu1 %v218_v4  ;;  %v228_v14 = vld [vmem:[#allocation7 + $0x1] ss:$0 sm:$0xff]  ;;  %v229_v20 = vld [vmem:[#allocation7 + $0x2] ss:$0 sm:$0xff] }
  0x13   :  { %90 = vmatpush.bf16.msra.mxu0 %v215_v1 }
  0x14   :  { %162 = vmatpush.bf16.msra.mxu2 %v219_v13 }
  0x15   :  { %126 = vmatpush.bf16.msra.mxu1 %v217_v5 }
  0x16   :  { %196 = vmatmul.msk.bf16.vlgmr.msra.gmra.mxu0 %vm79_vm0, %v64_v3 }
  0x93   :  { %v92_v7 = vpop.f32.mrf.mxu0 }
  0x94   :  { %v93_v8 = vadd.f32 %v227_v6, %v92_v7 }
  0x96   :  { %v96_v9 = vmax.f32 %v93_v8, 0.0 }
  0x98   :  { %v101_v10 = vpack.c.bf16 %v96_v9, %v96_v9 }
  0x9a   :  { %205 = vmatmul.msk.bf16.vlgmr.msra.gmra.mxu1 %vm79_vm0, %v101_v10 }
  0x9b   :  { %v94_v11 = vpop.f32.mrf.mxu0 }
 0x117   :  { %v128_v15 = vpop.f32.mrf.mxu1 }
 0x118   :  { %v129_v16 = vadd.f32 %v228_v14, %v128_v15 }
 0x11a   :  { %v132_v17 = vmax.f32 %v129_v16, 0.0 }
 0x11c   :  { %v137_v18 = vpack.c.bf16 %v132_v17, %v132_v17 }
 0x11e   :  { %214 = vmatmul.msk.bf16.vlgmr.msra.gmra.mxu2 %vm79_vm0, %v137_v18 }
 0x11f   :  { %v130_v19 = vpop.f32.mrf.mxu1 }
 0x1a1   :  { %v164_v21 = vpop.f32.mrf.mxu2 }
 0x1a2   :  { %v165_v22 = vadd.f32 %v229_v20, %v164_v21 }
 0x1a4   :  { %169 = vst.msk [vmem:[#allocation8] sm:$0x3] %vm168_vm1, %v165_v22 }
 0x1a5   :  { %180 = dma.vmem_to_hbm [thread:$0]  %s176_s2, 32, %s178_s30, [#allocation4]  }
 0x1a9   :  { %v166_v23 = vpop.f32.mrf.mxu2 }
 0x1aa   :  { %330 = dma.done.wait [#allocation4], 32  }
 0x1ab   :  { %331 = vsyncadd [#allocation4], 4294967264 }
 0x1ac   :  { %185 = vsyncpa [#allocation3], 1 }
 0x1ad   :  { %186 = vsyncpa [#allocation6], 1 }
 0x1ae   :  { %187 = vsyncpa [#allocation4], 1 }

</bundles_post_ra>
